<compile_context>
chip_gen: v5e
topology: v5e:2x2
jax: 0.10.0
libtpu: 0.0.40
codegen_flags: <defaults>
</compile_context>

<pallas_src>
import functools

import jax
import jax.numpy as jnp
from jax.experimental import pallas as pl
from jax.experimental.pallas import tpu as pltpu


def _gaussian_smearing_kernel(dist_ref, offset_ref, out_ref, *, scale, n_chunks,
                              chunk, g):
    # dist_ref:   (1, TN)       lane-dense row of flattened distances
    # offset_ref: (G_PAD, C)    gaussian centers, pre-scaled & pre-broadcast
    # out_ref:    (TN, G)       output block already in the PyTorch (N, G) layout
    for c in range(n_chunks):                       # static unroll; small live ranges
        lo = c * chunk
        d = dist_ref[:, lo:lo + chunk] * scale      # (1, C): scaled once per chunk
        diff = d - offset_ref[...]                  # (G_PAD, C): full-lane VPU work
        y = jnp.exp(-(diff * diff))                 # (G_PAD, C): full-lane EUP work
        t = jnp.transpose(y, (1, 0))                # (C, G_PAD): XLU (idle otherwise)
        out_ref[lo:lo + chunk, :] = t[:, :g].astype(out_ref.dtype)


def gaussian_smearing(dist, start=0.0, stop=5.0, num_gaussians=50,
                      tile_n=16384, chunk_n=512):
    """Pallas implementation of GaussianSmearing.forward.

    dist: any-shaped float array; flattened like dist.view(-1, 1).
    Returns (N, num_gaussians) float32 with the same values as the PyTorch module.
    """
    if num_gaussians < 2:
        raise ValueError("num_gaussians must be >= 2 (offset[1]-offset[0] is used).")
    g = int(num_gaussians)
    step = (stop - start) / (g - 1)
    coeff = -0.5 / step ** 2
    scale = float((-coeff) ** 0.5)              # exp(coeff*x^2) == exp(-(scale*x)^2)

    dist_flat = jnp.reshape(dist, (-1,)).astype(jnp.float32)
    n = dist_flat.shape[0]
    if n == 0:
        return jnp.zeros((0, g), jnp.float32)

    # --- tile sizing --------------------------------------------------------
    n_ext = ((n + 127) // 128) * 128            # lane-aligned extent (never materialized)
    tn = max(128, (min(int(tile_n), n_ext) // 128) * 128)
    if n_ext >= 256:                            # >= 2 grid steps for v7x's 2 TensorCores
        tn = min(tn, max(128, ((n_ext // 2) // 128) * 128))
    ct = max(128, (min(int(chunk_n), tn) // 128) * 128)
    tn = (tn // ct) * ct                        # tile is an exact multiple of the chunk
    n_chunks = tn // ct
    grid = (pl.cdiv(n, tn),)

    # --- operands -----------------------------------------------------------
    g_pad = ((g + 7) // 8) * 8                  # sublane-aligned gaussian count
    offset = jnp.linspace(start, stop, g, dtype=jnp.float32) * scale
    offset_pad = jnp.zeros((g_pad,), jnp.float32).at[:g].set(offset)
    offset_tile = jnp.broadcast_to(offset_pad[:, None], (g_pad, ct))  # hoisted broadcast
    dist_row = dist_flat.reshape(1, n)

    kernel = functools.partial(_gaussian_smearing_kernel, scale=scale,
                               n_chunks=n_chunks, chunk=ct, g=g)
    return pl.pallas_call(
        kernel,
        out_shape=jax.ShapeDtypeStruct((n, g), jnp.float32),
        grid_spec=pltpu.PrefetchScalarGridSpec(
            num_scalar_prefetch=0,
            grid=grid,
            in_specs=[
                # dist: lane-dense row blocks marching along the grid axis.
                pl.BlockSpec((1, tn), lambda i: (0, i)),
                # offsets: constant index_map -> resident across the grid.
                pl.BlockSpec((g_pad, ct), lambda i: (0, 0)),
            ],
            # Output written directly in the PyTorch (N, G) layout.
            out_specs=pl.BlockSpec((tn, g), lambda i: (i, 0)),
        ),
        compiler_params=pltpu.CompilerParams(
            dimension_semantics=("parallel",),      # shardable across v7x's 2 TCs
            vmem_limit_bytes=32 * 1024 * 1024,      # v5e scoped default is only 16 MiB
        ),
    )(dist_row, offset_tile)


def _reference(dist, start=0.0, stop=5.0, num_gaussians=50):
    offset = jnp.linspace(start, stop, num_gaussians, dtype=jnp.float32)
    step = (stop - start) / (num_gaussians - 1)
    coeff = -0.5 / step ** 2
    d = jnp.reshape(dist, (-1, 1)).astype(jnp.float32) - offset.reshape(1, -1)
    return jnp.exp(coeff * d * d)


if __name__ == "__main__":
    key = jax.random.PRNGKey(0)
    # Typical input: a 1-D tensor of pairwise distances (e.g. graph edges).
    n_edges = 200
    dist = jax.random.uniform(key, (n_edges,), jnp.float32, 0.0, 5.0)

    out = jax.block_until_ready(gaussian_smearing(dist))
    ref = _reference(dist)
    assert out.shape == (n_edges, 50), out.shape
    assert jnp.allclose(out, ref, atol=1e-5, rtol=1e-5), float(
        jnp.max(jnp.abs(out - ref))
    )

    # A non-multiple-of-128 size with a small tile/chunk to exercise the
    # multi-step grid, the partial boundary block, and the multi-chunk loop.
    n2 = 1100
    dist2 = jax.random.uniform(jax.random.PRNGKey(1), (n2,), jnp.float32, 0.0, 5.0)
    out2 = jax.block_until_ready(gaussian_smearing(dist2, tile_n=512, chunk_n=256))
    ref2 = _reference(dist2)
    assert out2.shape == (n2, 50), out2.shape
    assert jnp.allclose(out2, ref2, atol=1e-5, rtol=1e-5), float(
        jnp.max(jnp.abs(out2 - ref2))
    )

    print("KERNEL_OK")
</pallas_src>

<mosaic_0001>
module attributes {stable_mosaic.version = 11 : i64} {
  func.func @_gaussian_smearing_kernel(%arg0: i32, %arg1: memref<1x128xf32, #tpu.memory_space<vmem>>, %arg2: memref<56x128xf32, #tpu.memory_space<vmem>>, %arg3: memref<128x50xf32, #tpu.memory_space<vmem>>) attributes {dimension_semantics = [#tpu.dimension_semantics<parallel>], iteration_bounds = array<i64: 2>, scalar_prefetch = 0 : i64, scratch_operands = 0 : i64, tpu.core_type = #tpu.core_type<tc>, window_params = [{transform_indices = @transform_0, window_bounds = array<i64: 1, 128>}, {pipeline_mode = #tpu.pipeline_mode<synchronous>, transform_indices = @transform_1, window_bounds = array<i64: 56, 128>}, {transform_indices = @transform_2, window_bounds = array<i64: 128, 50>}]} {
    %c0 = arith.constant 0 : index
    %c0_0 = arith.constant 0 : index
    %0 = vector.load %arg1[%c0, %c0_0] : memref<1x128xf32, #tpu.memory_space<vmem>>, vector<1x128xf32>
    %cst = arith.constant 6.92964649 : f32
    %1 = vector.broadcast %cst : f32 to vector<1x128xf32>
    %2 = arith.mulf %0, %1 : vector<1x128xf32>
    %c0_1 = arith.constant 0 : index
    %c0_2 = arith.constant 0 : index
    %3 = vector.load %arg2[%c0_1, %c0_2] : memref<56x128xf32, #tpu.memory_space<vmem>>, vector<56x128xf32>
    %4 = vector.broadcast %2 : vector<1x128xf32> to vector<56x128xf32>
    %5 = arith.subf %4, %3 : vector<56x128xf32>
    %6 = arith.mulf %5, %5 : vector<56x128xf32>
    %cst_3 = arith.constant 0.000000e+00 : f32
    %7 = vector.broadcast %cst_3 : f32 to vector<56x128xf32>
    %8 = arith.subf %7, %6 : vector<56x128xf32>
    %9 = math.exp %8 : vector<56x128xf32>
    %10 = tpu.transpose %9, [1, 0] : vector<56x128xf32> -> vector<128x56xf32>
    %11 = vector.extract_strided_slice %10 {offsets = [0, 0], sizes = [128, 50], strides = [1, 1]} : vector<128x56xf32> to vector<128x50xf32>
    %c0_4 = arith.constant 0 : index
    %c0_5 = arith.constant 0 : index
    %12 = vector.load %arg3[%c0_4, %c0_5] : memref<128x50xf32, #tpu.memory_space<vmem>>, vector<128x50xf32>
    tpu.vector_store %arg3[%c0_4, %c0_5], %11 {strides = array<i32>} : memref<128x50xf32, #tpu.memory_space<vmem>>, vector<128x50xf32>,
    return
  }
  func.func @transform_0(%arg0: i32) -> (i32, i32) {
    %c0_i32 = arith.constant 0 : i32
    %c0_i32_0 = arith.constant 0 : i32
    return %c0_i32, %arg0 : i32, i32
  }
  func.func @transform_1(%arg0: i32) -> (i32, i32) {
    %c0_i32 = arith.constant 0 : i32
    %c0_i32_0 = arith.constant 0 : i32
    %c0_i32_1 = arith.constant 0 : i32
    return %c0_i32, %c0_i32_0 : i32, i32
  }
  func.func @transform_2(%arg0: i32) -> (i32, i32) {
    %c0_i32 = arith.constant 0 : i32
    %c0_i32_0 = arith.constant 0 : i32
    return %arg0, %c0_i32 : i32, i32
  }
}

</mosaic_0001>

<bundles_post_ra>
// kernel: tpu_custom_call.1
= control target key start
LH: loop header
LB: loop body
LE: loop exit
PB: predicated region body
PF: predicated region fallthrough
CT: control target
= control target key end

     0   :  { %7 = vsyncpa [#allocation3], 0  ;;  %s1140_s0 = inlined_call_operand.hbm [shape: f32[1,200], index: 0, kind: input, shape index: {}]   ;;  %s1141_s1 = inlined_call_operand.hbm [shape: f32[56,128], index: 1, kind: input, shape index: {}]   ;;  %s1142_s2 = inlined_call_operand.vmem [shape: f32[200,50], index: 2, kind: output, shape index: {}]  }
   0x1   :  { %9 = vsyncpa [#allocation3 + $0x1], 0 }
   0x2   :  { %10 = vsyncpa [#allocation5], 0  ;;  %s904_s9 = smov 0   ;;  %s906_s10 = smov 0  }
   0x3   :  { %s908_s11 = smov 0   ;;  %s910_s12 = smov 0  }
   0x4 LB: > { %s105_s15 = sshll.u32 %s1141_s1, 4  ;;  %s926_s16 = sadd.s32 4294967295, %s852_s12   ;;  %s852_s12 = sphi %s910_s12, %s1155_s12   ;;  %s848_s11 = sphi %s908_s11, %s1154_s11   ;;  %s844_s10 = sphi %s906_s10, %s1153_s10   ;;  %s840_s9 = sphi %s904_s9, %s1152_s9   ;;  %s106_s15 = int_to_ptr.hbm [resolvable:$true] %s105_s15 }
   0x5   : > { %p565_p0 = scmp.ge.s32.totalorder %s852_s12, 1  ;;  %p37_p1 = scmp.eq.s32.totalorder %s926_s16, 0 }
   0x6   : > { %p94_p2 = scmp.lt.s32.totalorder %s852_s12, 3  ;;  %s886_s18 = smov [#allocation4]  }
   0x7   : > { %s107_s19 = sshll.u32 %s886_s18, 4  ;;  %s887_s20 = smov 128   ;;  %s108_s19 = int_to_ptr.vmem [resolvable:$true] %s107_s19 }
   0x8   : > { %p931_p3 = pnand %p565_p0, %p94_p2  ;;  %s888_s21 = smov 8  }
   0x9   : > { %s940_s22 = sadd.s32 1, %s852_s12   ;;  %s23_s24 = sadd.s32 1, %s848_s11 }
   0xa   : > { %p597_p4 = pneg %p931_p3  ;;  %s20_s23 = ssub.s32 %s852_s12, %s940_s22 }
   0xb   : > { %p21_p6 = scmp.eq.s32.totalorder %s20_s23, 0  ;;  %p30_p7 = scmp.ne.s32.totalorder %s848_s11, %s844_s10 }
   0xc   : > { %p598_p5 = pnand %p597_p4, %p37_p1  ;;  %p31_p8 = scmp.eq.s32.totalorder %s852_s12, 0 }
   0xd   : > { %p36_p9 = scmp.ne.s32.totalorder %s844_s10, %s840_s9  ;;  %p81_p12 = scmp.eq.s32.totalorder %s926_s16, 1 }
   0xe   : > { %600 = dma.hbm_to_vmem [thread:$0]  (!%p598_p5), %s106_s15, 896, %s108_s19, [#allocation5], %s887_s20, %s887_s20, %s888_s21  }
   0xf   : > { %s950_s25 = scalar_select %p21_p6, %s848_s11, %s23_s24  }
  0x10   : > { %p32_p10 = por %p31_p8, %p30_p7  ;;  %p954_p11 = por %p37_p1, %p36_p9 }
  0x11   : > { %p606_p13 = scmp.lt.s32.totalorder %s852_s12, 2  ;;  %s121_s27 = sand.u32 1, %s848_s11  }
  0x12   : > { %s127_s30 = scalar_lea.hbm %s1140_s0, %s852_s12  ;;  %p965_p0 = por %p81_p12, %p30_p7 }
  0x13   : > { %s129_s4 = sshll.u32 %s127_s30, 4  ;;  %s124_s5 = scalar_lea.vmem [#allocation2], %s121_s27  ;;  %s130_s4 = int_to_ptr.hbm [resolvable:$true] %s129_s4 }
  0x14   : > { %s131_s6 = sshll.u32 %s124_s5, 4  ;;  %p969_p2 = pnand %p606_p13, %p32_p10  ;;  %s132_s6 = int_to_ptr.vmem [resolvable:$true] %s131_s6 }
  0x15   : > { %s122_s8 = scalar_lea.sflag [#allocation3], %s121_s27  ;;  %s752_s9 = sshra.s32 %s130_s4, 4  ;;  %s753_s9 = int_to_ptr.hbm [resolvable:$true] %s752_s9 }
  0x16   : > { %s754_s13 = scalar_lea.hbm %s753_s9, 1  ;;  %p756_p5 = pneg %p969_p2 }
  0x17   : > { %p755_p4 = scmp.ne.s32.totalorder %s753_s9, %s754_s13  ;;  %s759_s15 = scalar_lea.hbm %s1140_s0, 2 }
  0x18   : > { %p760_p8 = scmp.lt.s32.totalorder %s753_s9, %s1140_s0  ;;  %p761_p9 = scmp.lt.s32.totalorder %s759_s15, %s754_s13 }
  0x19   : > { %p757_p6 = pnand %p756_p5, %p755_p4 }
  0x1a   : > { %p762_p10 = por %p761_p9, %p760_p8 }
  0x1b   : > { %p758_p7 = pneg %p757_p6 }
  0x1d   : > { %p763_p12 = pnand %p762_p10, %p758_p7 }
  0x1f   : > { %766 = shalt.err (!%p763_p12)
}
  0x20   : > { %604 = dma.hbm_to_vmem [thread:$0]  (!%p969_p2), %s130_s4, 16, %s132_s6, %s122_s8  }
  0x21   : > { %140 = sbr.rel (%p931_p3) target bundleno = 395 (0x18b), region = 28  ;;  %s986_s20 = sand.u32 (!%p931_p3), 1, %s844_s10  }
  0x22   : > { %s143_s21 = scalar_lea.sflag (!%p931_p3), [#allocation3], %s986_s20  ;;  %s145_s23 = scalar_lea.vmem (!%p931_p3), [#allocation2], %s986_s20 }
  0x26   : > { %831 = dma.done.wait (%p954_p11), %s143_s21, 16  }
  0x27   : > { %833 = vsyncadd (%p954_p11), %s143_s21, 4294967280 }
  0x28   : > { %835 = dma.done.wait (%p37_p1), [#allocation5], 896  }
  0x29   : > { %837 = vsyncadd (%p37_p1), [#allocation5], 4294966400  ;;  %v175_v0 = vld [vmem:[%s145_s23] sm:$0x1]  ;;  %v177_v2 = vld [vmem:[#allocation4] sm:$0xff]  ;;  %s570_s17 = sshll.u32 %s986_s20, 7 }
  0x2a   : > { %v176_v1 = vmul.f32 6.9296465, %v175_v0  ;;  %v178_v3 = vld [vmem:[#allocation4 + $0x8] sm:$0xff]  ;;  %v179_v9 = vld [vmem:[#allocation4 + $0x10] sm:$0xff]  ;;  %v180_v16 = vld [vmem:[#allocation4 + $0x18] sm:$0xff]  ;;  %vm254_vm0 = vcmask 408576  }
  0x2b   : > { %v181_v22 = vld [vmem:[#allocation4 + $0x20] sm:$0xff]  ;;  %v182_v28 = vld [vmem:[#allocation4 + $0x28] sm:$0xff]  ;;  %v183_v34 = vld [vmem:[#allocation4 + $0x30] sm:$0xff]  ;;  %s999_s24 = scalar_lea.vmem [#allocation6], %s570_s17   ;;  %s572_s26 = sshll.u32 (%p965_p0), %s926_s16, 4 }
  0x2c   : > { %v185_v4 = vperm.slane %v176_v1, 0  ;;  %s588_s27 = sshll.u32 (%p965_p0), %s926_s16, 7  ;;  %s279_s28 = ssub.s32 (%p965_p0), 25, %s572_s26 }
  0x2d   : > { %s1040_s4 = scalar_lea.vmem (%p965_p0), %s1142_s2, %s588_s27   ;;  %p280_p1 = scmp.lt.s32.totalorder (%p965_p0), %s279_s28, 16 }
  0x2e   : > { %v187_v5 = vsub.f32 %v185_v4, %v177_v2  ;;  %v188_v6 = vsub.f32 %v185_v4, %v178_v3  ;;  %v189_v13 = vsub.f32 %v185_v4, %v179_v9  ;;  %v190_v19 = vsub.f32 %v185_v4, %v180_v16 }
  0x2f   : > { %v191_v25 = vsub.f32 %v185_v4, %v181_v22  ;;  %v192_v31 = vsub.f32 %v185_v4, %v182_v28  ;;  %v193_v37 = vsub.f32 %v185_v4, %v183_v34 }
  0x30   : > { %v194_v7 = vmul.f32 %v187_v5, %v187_v5  ;;  %v195_v8 = vmul.f32 %v188_v6, %v188_v6  ;;  %v196_v15 = vmul.f32 %v189_v13, %v189_v13  ;;  %v197_v21 = vmul.f32 %v190_v19, %v190_v19 }
  0x31   : > { %v198_v27 = vmul.f32 %v191_v25, %v191_v25  ;;  %v199_v33 = vmul.f32 %v192_v31, %v192_v31  ;;  %v200_v39 = vmul.f32 %v193_v37, %v193_v37 }
  0x32   : > { %v201_v10 = vsub.f32 0.0, %v194_v7  ;;  %v202_v12 = vsub.f32 0.0, %v195_v8  ;;  %v203_v18 = vsub.f32 0.0, %v196_v15  ;;  %v204_v24 = vsub.f32 0.0, %v197_v21 }
  0x33   : > { %v205_v30 = vsub.f32 0.0, %v198_v27  ;;  %v206_v36 = vsub.f32 0.0, %v199_v33  ;;  %v207_v41 = vsub.f32 0.0, %v200_v39 }
  0x34   : > { %v208_v11 = vmul.f32 1.442695, %v201_v10  ;;  %v210_v14 = vmul.f32 1.442695, %v202_v12  ;;  %v212_v20 = vmul.f32 1.442695, %v203_v18 }
  0x35   : > { %v214_v26 = vmul.f32 1.442695, %v204_v24  ;;  %v216_v32 = vmul.f32 1.442695, %v205_v30  ;;  %v218_v38 = vmul.f32 1.442695, %v206_v36 }
  0x36   : > { %708 = vpow2.f32 %v208_v11  ;;  %v220_v42 = vmul.f32 1.442695, %v207_v41 }
  0x37   : > { %710 = vpow2.f32 %v210_v14 }
  0x38   : > { %712 = vpow2.f32 %v212_v20 }
  0x39   : > { %714 = vpow2.f32 %v214_v26 }
  0x3a   : > { %716 = vpow2.f32 %v216_v32 }
  0x3b   : > { %718 = vpow2.f32 %v218_v38 }
  0x3c   : > { %v709_v17 = vpop.eup %708  ;;  %720 = vpow2.f32 %v220_v42 }
  0x3d   : > { %222 = vxpose.xlu0.b32.start [1/7] (short) %v709_v17, 128  ;;  %v711_v23 = vpop.eup %710 }
  0x3e   : > { %v713_v29 = vpop.eup %712 }
  0x3f   : > { %v715_v35 = vpop.eup %714 }
  0x40   : > { %v717_v40 = vpop.eup %716 }
  0x41   : > { %v719_v43 = vpop.eup %718 }
  0x42   : > { %v721_v44 = vpop.eup %720 }
  0x45   : > { %223 = vxpose.xlu0.b32.cont [2/7] (short) %v711_v23, 128 }
  0x4d   : > { %224 = vxpose.xlu0.b32.cont [3/7] (short) %v713_v29, 128 }
  0x55   : > { %225 = vxpose.xlu0.b32.cont [4/7] (short) %v715_v35, 128 }
  0x5d   : > { %226 = vxpose.xlu0.b32.cont [5/7] (short) %v717_v40, 128 }
  0x65   : > { %227 = vxpose.xlu0.b32.cont [6/7] (short) %v719_v43, 128 }
  0x6d   : > { %228 = vxpose.xlu0.b32.end [7/7] (short) %v721_v44, 128 }
  0xe1   : > { %v238_v45 = vpop.trf.xlu0 }
  0xe2   : > { %255 = vst.msk [vmem:[%s999_s24] sm:$0xff] %vm254_vm0, %v238_v45 }
  0xe9   : > { %v239_v46 = vpop.trf.xlu0 }
  0xea   : > { %256 = vst.msk [vmem:[%s999_s24 + $0x8] sm:$0xff] %vm254_vm0, %v239_v46 }
  0xf1   : > { %v240_v47 = vpop.trf.xlu0 }
  0xf2   : > { %257 = vst.msk [vmem:[%s999_s24 + $0x10] sm:$0xff] %vm254_vm0, %v240_v47 }
  0xf9   : > { %v241_v48 = vpop.trf.xlu0 }
  0xfa   : > { %258 = vst.msk [vmem:[%s999_s24 + $0x18] sm:$0xff] %vm254_vm0, %v241_v48 }
 0x101   : > { %v242_v49 = vpop.trf.xlu0 }
 0x102   : > { %259 = vst.msk [vmem:[%s999_s24 + $0x20] sm:$0xff] %vm254_vm0, %v242_v49 }
 0x109   : > { %v243_v50 = vpop.trf.xlu0 }
 0x10a   : > { %260 = vst.msk [vmem:[%s999_s24 + $0x28] sm:$0xff] %vm254_vm0, %v243_v50 }
 0x111   : > { %v244_v51 = vpop.trf.xlu0 }
 0x112   : > { %261 = vst.msk [vmem:[%s999_s24 + $0x30] sm:$0xff] %vm254_vm0, %v244_v51 }
 0x119   : > { %v245_v52 = vpop.trf.xlu0 }
 0x11a   : > { %262 = vst.msk [vmem:[%s999_s24 + $0x38] sm:$0xff] %vm254_vm0, %v245_v52 }
 0x121   : > { %v246_v53 = vpop.trf.xlu0 }
 0x122   : > { %263 = vst.msk [vmem:[%s999_s24 + $0x40] sm:$0xff] %vm254_vm0, %v246_v53 }
 0x129   : > { %v247_v54 = vpop.trf.xlu0 }
 0x12a   : > { %264 = vst.msk [vmem:[%s999_s24 + $0x48] sm:$0xff] %vm254_vm0, %v247_v54 }
 0x131   : > { %v248_v55 = vpop.trf.xlu0 }
 0x132   : > { %265 = vst.msk [vmem:[%s999_s24 + $0x50] sm:$0xff] %vm254_vm0, %v248_v55 }
 0x139   : > { %v249_v56 = vpop.trf.xlu0 }
 0x13a   : > { %266 = vst.msk [vmem:[%s999_s24 + $0x58] sm:$0xff] %vm254_vm0, %v249_v56 }
 0x141   : > { %v250_v57 = vpop.trf.xlu0 }
 0x142   : > { %267 = vst.msk [vmem:[%s999_s24 + $0x60] sm:$0xff] %vm254_vm0, %v250_v57 }
 0x149   : > { %v251_v58 = vpop.trf.xlu0 }
 0x14a   : > { %268 = vst.msk [vmem:[%s999_s24 + $0x68] sm:$0xff] %vm254_vm0, %v251_v58 }
 0x151   : > { %v252_v59 = vpop.trf.xlu0 }
 0x152   : > { %269 = vst.msk [vmem:[%s999_s24 + $0x70] sm:$0xff] %vm254_vm0, %v252_v59 }
 0x156   : > { %277 = sbr.rel (!%p965_p0) target bundleno = 395 (0x18b), region = 40 }
 0x159   : > { %v253_v60 = vpop.trf.xlu0 }
 0x15a   : > { %270 = vst.msk [vmem:[%s999_s24 + $0x78] sm:$0xff] %vm254_vm0, %v253_v60 }
 0x15b   : > { %s1157_s28 = smov (!%p280_p1, %s279_s28), 16 }
 0x15c   : > { %s573_s5 = sshll.u32 %s1157_s28, 3 }
 0x15d   : > { %p576_p3 = scmp.eq.s32.totalorder %s573_s5, 0 }
 0x15e   : > { %s1046_s3 = sshrl.u32 (!%p576_p3), %s1157_s28, 4 }
 0x15f   : > { %288 = sbr.rel (%p576_p3) target bundleno = 395 (0x18b), region = 44  ;;  %p577_p11 = scmp.le.s32.totalorder (!%p576_p3), %s1046_s3, 0 }
 0x164   : > { %508 = sbr.rel (%p577_p11) target bundleno = 378 (0x17a), region = 126  ;;  %s1147_s16 = smov (!%p577_p11), %s1040_s4 }
 0x165   : > { %s1148_s6 = smov (!%p577_p11), %s999_s24  ;;  %s1055_s7 = smov (!%p577_p11), 0  }
 0x166   : > { %s1057_s8 = smov (!%p577_p11), 0  }
 0x169 LB: >> { %v381_v61 = vld [vmem:[%s860_s6] sm:$0xff]  ;;  %v383_v62 = vld [vmem:[%s860_s6 + $0x8] sm:$0xff]  ;;  %v385_v63 = vld [vmem:[%s860_s6 + $0x10] sm:$0xff]  ;;  %s413_s9 = sadd.s32 1, %s864_s7  ;;  %s375_s8 = sadd.s32 1, %s868_s8   ;;  %s868_s8 = sphi %s1057_s8, %s375_s8   ;;  %s864_s7 = sphi %s1055_s7, %s1151_s7   ;;  %s860_s6 = sphi %s1148_s6, %s1150_s6   ;;  %s856_s16 = sphi %s1147_s16, %s1149_s16  }
 0x16a   : >> { %382 = vst [vmem:[%s856_s16] sm:$0xff] %v381_v61  ;;  %v387_v0 = vld [vmem:[%s860_s6 + $0x18] sm:$0xff]  ;;  %p414_p13 = scmp.ge.s32.totalorder %s413_s9, %s1046_s3  ;;  %v389_v1 = vld [vmem:[%s860_s6 + $0x20] sm:$0xff]  ;;  %v391_v2 = vld [vmem:[%s860_s6 + $0x28] sm:$0xff]  ;;  %p374_p0 = scmp.ge.s32.totalorder %s375_s8, %s1046_s3 }
 0x16b   : >> { %384 = vst [vmem:[%s856_s16 + $0x8] sm:$0xff] %v383_v62  ;;  %v393_v3 = vld [vmem:[%s860_s6 + $0x30] sm:$0xff]  ;;  %v395_v4 = vld [vmem:[%s860_s6 + $0x38] sm:$0xff]  ;;  %v397_v5 = vld [vmem:[%s860_s6 + $0x40] sm:$0xff] }
 0x16c   : >> { %386 = vst [vmem:[%s856_s16 + $0x10] sm:$0xff] %v385_v63  ;;  %s1159_s9 = smov (%p414_p13, %s413_s9), 0  ;;  %v399_v6 = vld [vmem:[%s860_s6 + $0x48] sm:$0xff]  ;;  %v401_v7 = vld [vmem:[%s860_s6 + $0x50] sm:$0xff]  ;;  %v403_v8 = vld [vmem:[%s860_s6 + $0x58] sm:$0xff] }
 0x16d   : >> { %388 = vst [vmem:[%s856_s16 + $0x18] sm:$0xff] %v387_v0  ;;  %s578_s13 = sshll.u32 %s1159_s9, 7  ;;  %v405_v9 = vld [vmem:[%s860_s6 + $0x60] sm:$0xff]  ;;  %v407_v10 = vld [vmem:[%s860_s6 + $0x68] sm:$0xff]  ;;  %v409_v11 = vld [vmem:[%s860_s6 + $0x70] sm:$0xff]  ;;  %s1151_s7 = smov %s1159_s9 }
 0x16e   : >> { %390 = vst [vmem:[%s856_s16 + $0x20] sm:$0xff] %v389_v1  ;;  %s418_s12 = scalar_lea.vmem %s999_s24, %s578_s13 [#allocation6]   ;;  %s419_s14 = scalar_lea.vmem %s1040_s4, %s578_s13   ;;  %v411_v12 = vld [vmem:[%s860_s6 + $0x78] sm:$0xff] }
 0x16f   : >> { %392 = vst [vmem:[%s856_s16 + $0x28] sm:$0xff] %v391_v2  ;;  %s1150_s6 = smov %s418_s12 }
 0x170   : >> { %394 = vst [vmem:[%s856_s16 + $0x30] sm:$0xff] %v393_v3 }
 0x171   : >> { %396 = vst [vmem:[%s856_s16 + $0x38] sm:$0xff] %v395_v4 }
 0x172   : >> { %398 = vst [vmem:[%s856_s16 + $0x40] sm:$0xff] %v397_v5 }
 0x173   : >> { %400 = vst [vmem:[%s856_s16 + $0x48] sm:$0xff] %v399_v6 }
 0x174   : >> { %402 = vst [vmem:[%s856_s16 + $0x50] sm:$0xff] %v401_v7 }
 0x175   : >> { %404 = vst [vmem:[%s856_s16 + $0x58] sm:$0xff] %v403_v8  ;;  %377 = sbr.rel (!%p374_p0) target bundleno = 361 (0x169), region = 132 }
 0x176   : >> { %406 = vst [vmem:[%s856_s16 + $0x60] sm:$0xff] %v405_v9 }
 0x177   : >> { %408 = vst [vmem:[%s856_s16 + $0x68] sm:$0xff] %v407_v10 }
 0x178   : >> { %410 = vst [vmem:[%s856_s16 + $0x70] sm:$0xff] %v409_v11 }
 0x179   : >> { %412 = vst [vmem:[%s856_s16 + $0x78] sm:$0xff] %v411_v12  ;;  %s1149_s16 = smov %s419_s14 }
 0x17a PF: > { %s1119_s15 = sand.u32 15, %s1157_s28   ;;  %s589_s18 = sshll.u32 %s1046_s3, 7 }
 0x17b   : > { %s424_s19 = scalar_lea.vmem %s999_s24, %s589_s18 [#allocation6]   ;;  %s426_s20 = scalar_lea.vmem %s1040_s4, %s589_s18  }
 0x17c   : > { %p583_p2 = scmp.le.s32.totalorder %s1119_s15, 0 }
 0x17d   : > { %s870_s21 = smov (!%p583_p2), %s426_s20   ;;  %s874_s23 = smov (!%p583_p2), %s424_s19  }
 0x17e   : > { %522 = sbr.rel (%p583_p2) target bundleno = 395 (0x18b), region = 137  ;;  %s878_s17 = smov (!%p583_p2), 0  }
 0x17f   : > { %s882_s26 = smov (!%p583_p2), 0  }
 0x183 LB: >> { %v436_v13 = vld [vmem:[%s876_s23] sm:$0xff]  ;;  %s438_s27 = sadd.s32 1, %s880_s17  ;;  %s430_s26 = sadd.s32 1, %s884_s26   ;;  %s884_s26 = sphi %s882_s26, %s430_s26   ;;  %s880_s17 = sphi %s878_s17, %s879_s17   ;;  %s876_s23 = sphi %s874_s23, %s443_s23   ;;  %s872_s21 = sphi %s870_s21, %s444_s21  }
 0x184   : >> { %437 = vst [vmem:[%s872_s21] sm:$0xff] %v436_v13  ;;  %p439_p4 = scmp.ge.s32.totalorder %s438_s27, %s1119_s15  ;;  %p429_p5 = scmp.ge.s32.totalorder %s430_s26, %s1119_s15 }
 0x186   : >> { %s1161_s27 = smov (%p439_p4, %s438_s27), 0  ;;  %432 = sbr.rel (!%p429_p5) target bundleno = 387 (0x183), region = 143 }
 0x187   : >> { %s584_s24 = sshll.u32 %s1161_s27, 3  ;;  %s879_s17 = smov %s1161_s27  }
 0x188   : >> { %s443_s23 = scalar_lea.vmem %s424_s19, %s584_s24 [#allocation6]   ;;  %s444_s21 = scalar_lea.vmem %s426_s20, %s584_s24  }
 0x18b PF: > { %p13_p6 = scmp.ge.s32.totalorder %s940_s22, 4   ;;  %s1152_s9 = smov %s844_s10 }
 0x18c   : > { %s1153_s10 = smov %s848_s11  ;;  %s1154_s11 = smov %s950_s25 }
 0x18d   : > { %s1155_s12 = smov %s940_s22  ;;  %15 = sbr.rel (!%p13_p6) target bundleno = 4 (0x4), region = 154 }
 0x192   :  { %460 = vsyncpa [#allocation3], 1 }
 0x193   :  { %462 = vsyncpa [#allocation3 + $0x1], 1 }
 0x194   :  { %463 = vsyncpa [#allocation5], 1 }

</bundles_post_ra>
